<compile_context>
chip_gen: v7x
topology: tpu7x:2x2x1
jax: 0.10.0
libtpu: 0.0.40
codegen_flags: <defaults>
</compile_context>

<pallas_src>
import jax
import jax.numpy as jnp
from jax.experimental import pallas as pl
from jax.experimental.pallas import tpu as pltpu

KERNEL_SIZE = 7
PAD = 3  # padding = 3 for kernel_size = 7 (same-length conv)


def spatial_attention_kernel(w_ref, x_ref, o_ref):
    """One grid step = one batch tile.

    w_ref : SMEM (2, K)           Conv1d weight (out channel squeezed): w[0] -> avg
                                  taps, w[1] -> max taps.
    x_ref : VMEM (TB, C, L)       batch tile of the input.
    o_ref : VMEM (TB, L) or (TB, 1, L)   sigmoid(conv(cat([avg, max]))).
    """
    TB, C, L = x_ref.shape
    dtype = x_ref.dtype

    # ---- Fused single-pass channel pooling (one sweep of x from VMEM) ----------
    # Sublane-sized chunks: 8 rows for 32-bit, 16 for 16-bit, 32 for 8-bit dtypes.
    CH = max(8, 32 // jnp.dtype(dtype).itemsize)

    # First chunk seeds both accumulators (no zero / -inf init pass).
    first = x_ref[:, 0:min(CH, C), :]                       # (TB, ch, L)
    s = jnp.sum(first.astype(jnp.float32), axis=1)          # f32 running sum (TB, L)
    m = jnp.max(first, axis=1)                              # native-dtype running max

    for c0 in range(CH, C, CH):                              # static chunk starts
        chunk = x_ref[:, c0:min(c0 + CH, C), :]              # loaded exactly once
        s = s + jnp.sum(chunk.astype(jnp.float32), axis=1)
        m = jnp.maximum(m, jnp.max(chunk, axis=1))

    avg = s * (1.0 / C)                                      # compile-time 1/C
    mx = m.astype(jnp.float32)

    # ---- Zero-padded "same" 7-tap conv: roll (XLU) + scalar-broadcast FMAs (VPU) ----
    #   conv[l] = sum_k w0[k] * avg[l + k - PAD] + w1[k] * mx[l + k - PAD]
    # Centre tap (off == 0) needs no mask and seeds the accumulator.
    acc = w_ref[0, PAD] * avg + w_ref[1, PAD] * mx           # (TB, L) f32
    lane = jax.lax.broadcasted_iota(jnp.int32, (TB, L), 1)

    for k in range(KERNEL_SIZE):                              # static, fully unrolled
        if k == PAD:
            continue
        off = k - PAD
        shift = (-off) % L                                    # result[l] = src[(l+off) % L]
        sh_avg = pltpu.roll(avg, shift=shift, axis=1)
        sh_mx = pltpu.roll(mx, shift=shift, axis=1)
        tap = w_ref[0, k] * sh_avg + w_ref[1, k] * sh_mx
        # One-sided validity test (the other bound is automatically satisfied).
        valid = (lane >= -off) if off < 0 else (lane < L - off)
        acc = acc + jnp.where(valid, tap, 0.0)

    out = jax.nn.sigmoid(acc).astype(o_ref.dtype)             # (TB, L)
    if o_ref.ndim == 2:            # sublane/lane-dense squeezed output block
        o_ref[...] = out
    else:                          # (TB, 1, L) fallback for odd small-batch tilings
        o_ref[:, 0, :] = out


def _vmem_capacity_bytes():
    """Physical VMEM per TensorCore; conservative 64 MiB if the query fails."""
    try:
        return int(pltpu.get_tpu_info().vmem_capacity_bytes)
    except Exception:
        return 64 * 1024 * 1024


def spatial_attention(x, conv_weight, *, batch_tile=None, vmem_limit_bytes=None):
    """x: (B, C, L); conv_weight: (1, 2, K) PyTorch Conv1d weight. Returns (B, 1, L)."""
    B, C, L = x.shape
    assert conv_weight.shape[-1] == KERNEL_SIZE
    w2 = conv_weight.reshape(2, KERNEL_SIZE).astype(jnp.float32)   # SMEM scalars

    elem = jnp.dtype(x.dtype).itemsize
    per_batch_bytes = C * L * elem

    vmem_phys = _vmem_capacity_bytes()
    small_vmem = vmem_phys <= (80 << 20)            # v7x-class: 64 MiB / TC, 2 TCs
    block_budget = (12 << 20) if small_vmem else (16 << 20)

    if batch_tile is None:
        tb = max(1, min(B, block_budget // max(1, per_batch_bytes)))
        if small_vmem and B >= 2:
            # 2 TensorCores per chip: keep >= 2 grid blocks, split evenly.
            tb = min(tb, pl.cdiv(B, 2))
        # Keep the squeezed (TB, L) output block sublane-dense when tiling the batch.
        if tb < B and tb % 8 != 0 and tb > 8:
            tb = (tb // 8) * 8
    else:
        tb = int(batch_tile)
    tb = max(1, min(tb, B))

    squeeze_out = (tb == B) or (tb % 8 == 0)
    n_blocks = pl.cdiv(B, tb)

    if vmem_limit_bytes is None:
        # 2x double-buffered input block + 2x output block + compiler-scratch headroom,
        # capped well below physical VMEM (matters on v5e's 16 MiB default scoped limit).
        need = 2 * tb * per_batch_bytes + 2 * tb * L * elem + (8 << 20)
        vmem_limit_bytes = int(min((vmem_phys * 3) // 4, max(32 << 20, need)))

    if squeeze_out:
        out_shape = jax.ShapeDtypeStruct((B, L), x.dtype)
        out_spec = pl.BlockSpec((tb, L), lambda b: (b, 0))
    else:
        out_shape = jax.ShapeDtypeStruct((B, 1, L), x.dtype)
        out_spec = pl.BlockSpec((tb, 1, L), lambda b: (b, 0, 0))

    out = pl.pallas_call(
        spatial_attention_kernel,
        out_shape=out_shape,
        grid=(n_blocks,),
        in_specs=[
            pl.BlockSpec(memory_space=pltpu.MemorySpace.SMEM),   # conv weight scalars
            pl.BlockSpec((tb, C, L), lambda b: (b, 0, 0)),       # batch tile of x
        ],
        out_specs=out_spec,
        compiler_params=pltpu.CompilerParams(
            dimension_semantics=("parallel",),
            vmem_limit_bytes=vmem_limit_bytes),
    )(w2, x)

    return out.reshape(B, 1, L)


def reference(x, conv_weight):
    """Pure-JAX reference mirroring the PyTorch forward."""
    avg = jnp.mean(x, axis=1, keepdims=True)
    mx = jnp.max(x, axis=1, keepdims=True)
    feat = jnp.concatenate([avg, mx], axis=1)   # (B, 2, L)
    out = jax.lax.conv_general_dilated(
        feat, conv_weight, window_strides=(1,), padding=[(PAD, PAD)],
        dimension_numbers=("NCH", "OIH", "NCH"))
    return jax.nn.sigmoid(out)


if __name__ == "__main__":
    key = jax.random.PRNGKey(0)
    kx, kw = jax.random.split(key)

    # Small shapes consistent with the module: (B, C, L); C=20 exercises multi-chunk
    # (2 full sublane chunks + a 4-row tail) fused pooling, L=128 is one lane tile.
    B, C, L = 2, 20, 128
    x = jax.random.normal(kx, (B, C, L), dtype=jnp.float32)
    # Deterministic synthetic Conv1d(2, 1, 7, bias=False) weight, shape (out=1, in=2, K=7).
    conv_weight = 0.1 * jax.random.normal(kw, (1, 2, KERNEL_SIZE), dtype=jnp.float32)

    out = jax.block_until_ready(spatial_attention(x, conv_weight))
    ref = jax.block_until_ready(reference(x, conv_weight))

    assert out.shape == (B, 1, L)
    assert jnp.allclose(out, ref, atol=1e-5, rtol=1e-5), (
        f"max abs err {jnp.max(jnp.abs(out - ref))}")

    print("KERNEL_OK")
</pallas_src>

<mosaic_0001>
module attributes {stable_mosaic.version = 11 : i64} {
  func.func @spatial_attention_kernel(%arg0: i32, %arg1: memref<2x7xf32, #tpu.memory_space<smem>>, %arg2: memref<1x20x128xf32, #tpu.memory_space<vmem>>, %arg3: memref<1x1x128xf32, #tpu.memory_space<vmem>>) attributes {dimension_semantics = [#tpu.dimension_semantics<parallel>], iteration_bounds = array<i64: 2>, scalar_prefetch = 0 : i64, scratch_operands = 0 : i64, tpu.core_type = #tpu.core_type<tc>, window_params = [{transform_indices = @transform_0, window_bounds = array<i64: 2, 7>}, {transform_indices = @transform_1, window_bounds = array<i64: 1, 20, 128>}, {transform_indices = @transform_2, window_bounds = array<i64: 1, 1, 128>}]} {
    %c0 = arith.constant 0 : index
    %c0_0 = arith.constant 0 : index
    %c0_1 = arith.constant 0 : index
    %0 = vector.load %arg2[%c0, %c0_0, %c0_1] : memref<1x20x128xf32, #tpu.memory_space<vmem>>, vector<1x8x128xf32>
    %cst = arith.constant dense<0.000000e+00> : vector<1x128xf32>
    %1 = vector.multi_reduction <add>, %0, %cst [1] : vector<1x8x128xf32> to vector<1x128xf32>
    %cst_2 = arith.constant dense<0xFF800000> : vector<1x128xf32>
    %2 = vector.multi_reduction <maximumf>, %0, %cst_2 [1] : vector<1x8x128xf32> to vector<1x128xf32>
    %c0_3 = arith.constant 0 : index
    %c8 = arith.constant 8 : index
    %c0_4 = arith.constant 0 : index
    %3 = vector.load %arg2[%c0_3, %c8, %c0_4] : memref<1x20x128xf32, #tpu.memory_space<vmem>>, vector<1x8x128xf32>
    %cst_5 = arith.constant dense<0.000000e+00> : vector<1x128xf32>
    %4 = vector.multi_reduction <add>, %3, %cst_5 [1] : vector<1x8x128xf32> to vector<1x128xf32>
    %5 = arith.addf %1, %4 : vector<1x128xf32>
    %cst_6 = arith.constant dense<0xFF800000> : vector<1x128xf32>
    %6 = vector.multi_reduction <maximumf>, %3, %cst_6 [1] : vector<1x8x128xf32> to vector<1x128xf32>
    %7 = arith.maximumf %2, %6 : vector<1x128xf32>
    %c0_7 = arith.constant 0 : index
    %c16 = arith.constant 16 : index
    %c0_8 = arith.constant 0 : index
    %8 = vector.load %arg2[%c0_7, %c16, %c0_8] : memref<1x20x128xf32, #tpu.memory_space<vmem>>, vector<1x4x128xf32>
    %cst_9 = arith.constant dense<0.000000e+00> : vector<1x128xf32>
    %9 = vector.multi_reduction <add>, %8, %cst_9 [1] : vector<1x4x128xf32> to vector<1x128xf32>
    %10 = arith.addf %5, %9 : vector<1x128xf32>
    %cst_10 = arith.constant dense<0xFF800000> : vector<1x128xf32>
    %11 = vector.multi_reduction <maximumf>, %8, %cst_10 [1] : vector<1x4x128xf32> to vector<1x128xf32>
    %12 = arith.maximumf %7, %11 : vector<1x128xf32>
    %cst_11 = arith.constant 5.000000e-02 : f32
    %13 = vector.broadcast %cst_11 : f32 to vector<1x128xf32>
    %14 = arith.mulf %10, %13 : vector<1x128xf32>
    %c0_12 = arith.constant 0 : index
    %c3 = arith.constant 3 : index
    %15 = memref.load %arg1[%c0_12, %c3] : memref<2x7xf32, #tpu.memory_space<smem>>
    %16 = vector.broadcast %15 : f32 to vector<1x128xf32>
    %17 = arith.mulf %16, %14 : vector<1x128xf32>
    %c1 = arith.constant 1 : index
    %c3_13 = arith.constant 3 : index
    %18 = memref.load %arg1[%c1, %c3_13] : memref<2x7xf32, #tpu.memory_space<smem>>
    %19 = vector.broadcast %18 : f32 to vector<1x128xf32>
    %20 = arith.mulf %19, %12 : vector<1x128xf32>
    %21 = arith.addf %17, %20 : vector<1x128xf32>
    %22 = tpu.iota {dimensions = array<i32: 1>} : vector<1x128xi32>
    %c3_i32 = arith.constant 3 : i32
    %23 = tpu.dynamic_rotate %14 by %c3_i32 dim 1 : vector<1x128xf32>, i32 -> vector<1x128xf32>
    %c3_i32_14 = arith.constant 3 : i32
    %24 = tpu.dynamic_rotate %12 by %c3_i32_14 dim 1 : vector<1x128xf32>, i32 -> vector<1x128xf32>
    %c0_15 = arith.constant 0 : index
    %c0_16 = arith.constant 0 : index
    %25 = memref.load %arg1[%c0_15, %c0_16] : memref<2x7xf32, #tpu.memory_space<smem>>
    %26 = vector.broadcast %25 : f32 to vector<1x128xf32>
    %27 = arith.mulf %26, %23 : vector<1x128xf32>
    %c1_17 = arith.constant 1 : index
    %c0_18 = arith.constant 0 : index
    %28 = memref.load %arg1[%c1_17, %c0_18] : memref<2x7xf32, #tpu.memory_space<smem>>
    %29 = vector.broadcast %28 : f32 to vector<1x128xf32>
    %30 = arith.mulf %29, %24 : vector<1x128xf32>
    %31 = arith.addf %27, %30 : vector<1x128xf32>
    %c3_i32_19 = arith.constant 3 : i32
    %32 = vector.broadcast %c3_i32_19 : i32 to vector<1x128xi32>
    %33 = arith.cmpi sge, %22, %32 : vector<1x128xi32>
    %cst_20 = arith.constant 0.000000e+00 : f32
    %34 = vector.broadcast %cst_20 : f32 to vector<1x128xf32>
    %35 = arith.select %33, %31, %34 : vector<1x128xi1>, vector<1x128xf32>
    %36 = arith.addf %21, %35 : vector<1x128xf32>
    %c2_i32 = arith.constant 2 : i32
    %37 = tpu.dynamic_rotate %14 by %c2_i32 dim 1 : vector<1x128xf32>, i32 -> vector<1x128xf32>
    %c2_i32_21 = arith.constant 2 : i32
    %38 = tpu.dynamic_rotate %12 by %c2_i32_21 dim 1 : vector<1x128xf32>, i32 -> vector<1x128xf32>
    %c0_22 = arith.constant 0 : index
    %c1_23 = arith.constant 1 : index
    %39 = memref.load %arg1[%c0_22, %c1_23] : memref<2x7xf32, #tpu.memory_space<smem>>
    %40 = vector.broadcast %39 : f32 to vector<1x128xf32>
    %41 = arith.mulf %40, %37 : vector<1x128xf32>
    %c1_24 = arith.constant 1 : index
    %c1_25 = arith.constant 1 : index
    %42 = memref.load %arg1[%c1_24, %c1_25] : memref<2x7xf32, #tpu.memory_space<smem>>
    %43 = vector.broadcast %42 : f32 to vector<1x128xf32>
    %44 = arith.mulf %43, %38 : vector<1x128xf32>
    %45 = arith.addf %41, %44 : vector<1x128xf32>
    %c2_i32_26 = arith.constant 2 : i32
    %46 = vector.broadcast %c2_i32_26 : i32 to vector<1x128xi32>
    %47 = arith.cmpi sge, %22, %46 : vector<1x128xi32>
    %cst_27 = arith.constant 0.000000e+00 : f32
    %48 = vector.broadcast %cst_27 : f32 to vector<1x128xf32>
    %49 = arith.select %47, %45, %48 : vector<1x128xi1>, vector<1x128xf32>
    %50 = arith.addf %36, %49 : vector<1x128xf32>
    %c1_i32 = arith.constant 1 : i32
    %51 = tpu.dynamic_rotate %14 by %c1_i32 dim 1 : vector<1x128xf32>, i32 -> vector<1x128xf32>
    %c1_i32_28 = arith.constant 1 : i32
    %52 = tpu.dynamic_rotate %12 by %c1_i32_28 dim 1 : vector<1x128xf32>, i32 -> vector<1x128xf32>
    %c0_29 = arith.constant 0 : index
    %c2 = arith.constant 2 : index
    %53 = memref.load %arg1[%c0_29, %c2] : memref<2x7xf32, #tpu.memory_space<smem>>
    %54 = vector.broadcast %53 : f32 to vector<1x128xf32>
    %55 = arith.mulf %54, %51 : vector<1x128xf32>
    %c1_30 = arith.constant 1 : index
    %c2_31 = arith.constant 2 : index
    %56 = memref.load %arg1[%c1_30, %c2_31] : memref<2x7xf32, #tpu.memory_space<smem>>
    %57 = vector.broadcast %56 : f32 to vector<1x128xf32>
    %58 = arith.mulf %57, %52 : vector<1x128xf32>
    %59 = arith.addf %55, %58 : vector<1x128xf32>
    %c1_i32_32 = arith.constant 1 : i32
    %60 = vector.broadcast %c1_i32_32 : i32 to vector<1x128xi32>
    %61 = arith.cmpi sge, %22, %60 : vector<1x128xi32>
    %cst_33 = arith.constant 0.000000e+00 : f32
    %62 = vector.broadcast %cst_33 : f32 to vector<1x128xf32>
    %63 = arith.select %61, %59, %62 : vector<1x128xi1>, vector<1x128xf32>
    %64 = arith.addf %50, %63 : vector<1x128xf32>
    %c127_i32 = arith.constant 127 : i32
    %65 = tpu.dynamic_rotate %14 by %c127_i32 dim 1 : vector<1x128xf32>, i32 -> vector<1x128xf32>
    %c127_i32_34 = arith.constant 127 : i32
    %66 = tpu.dynamic_rotate %12 by %c127_i32_34 dim 1 : vector<1x128xf32>, i32 -> vector<1x128xf32>
    %c0_35 = arith.constant 0 : index
    %c4 = arith.constant 4 : index
    %67 = memref.load %arg1[%c0_35, %c4] : memref<2x7xf32, #tpu.memory_space<smem>>
    %68 = vector.broadcast %67 : f32 to vector<1x128xf32>
    %69 = arith.mulf %68, %65 : vector<1x128xf32>
    %c1_36 = arith.constant 1 : index
    %c4_37 = arith.constant 4 : index
    %70 = memref.load %arg1[%c1_36, %c4_37] : memref<2x7xf32, #tpu.memory_space<smem>>
    %71 = vector.broadcast %70 : f32 to vector<1x128xf32>
    %72 = arith.mulf %71, %66 : vector<1x128xf32>
    %73 = arith.addf %69, %72 : vector<1x128xf32>
    %c127_i32_38 = arith.constant 127 : i32
    %74 = vector.broadcast %c127_i32_38 : i32 to vector<1x128xi32>
    %75 = arith.cmpi slt, %22, %74 : vector<1x128xi32>
    %cst_39 = arith.constant 0.000000e+00 : f32
    %76 = vector.broadcast %cst_39 : f32 to vector<1x128xf32>
    %77 = arith.select %75, %73, %76 : vector<1x128xi1>, vector<1x128xf32>
    %78 = arith.addf %64, %77 : vector<1x128xf32>
    %c126_i32 = arith.constant 126 : i32
    %79 = tpu.dynamic_rotate %14 by %c126_i32 dim 1 : vector<1x128xf32>, i32 -> vector<1x128xf32>
    %c126_i32_40 = arith.constant 126 : i32
    %80 = tpu.dynamic_rotate %12 by %c126_i32_40 dim 1 : vector<1x128xf32>, i32 -> vector<1x128xf32>
    %c0_41 = arith.constant 0 : index
    %c5 = arith.constant 5 : index
    %81 = memref.load %arg1[%c0_41, %c5] : memref<2x7xf32, #tpu.memory_space<smem>>
    %82 = vector.broadcast %81 : f32 to vector<1x128xf32>
    %83 = arith.mulf %82, %79 : vector<1x128xf32>
    %c1_42 = arith.constant 1 : index
    %c5_43 = arith.constant 5 : index
    %84 = memref.load %arg1[%c1_42, %c5_43] : memref<2x7xf32, #tpu.memory_space<smem>>
    %85 = vector.broadcast %84 : f32 to vector<1x128xf32>
    %86 = arith.mulf %85, %80 : vector<1x128xf32>
    %87 = arith.addf %83, %86 : vector<1x128xf32>
    %c126_i32_44 = arith.constant 126 : i32
    %88 = vector.broadcast %c126_i32_44 : i32 to vector<1x128xi32>
    %89 = arith.cmpi slt, %22, %88 : vector<1x128xi32>
    %cst_45 = arith.constant 0.000000e+00 : f32
    %90 = vector.broadcast %cst_45 : f32 to vector<1x128xf32>
    %91 = arith.select %89, %87, %90 : vector<1x128xi1>, vector<1x128xf32>
    %92 = arith.addf %78, %91 : vector<1x128xf32>
    %c125_i32 = arith.constant 125 : i32
    %93 = tpu.dynamic_rotate %14 by %c125_i32 dim 1 : vector<1x128xf32>, i32 -> vector<1x128xf32>
    %c125_i32_46 = arith.constant 125 : i32
    %94 = tpu.dynamic_rotate %12 by %c125_i32_46 dim 1 : vector<1x128xf32>, i32 -> vector<1x128xf32>
    %c0_47 = arith.constant 0 : index
    %c6 = arith.constant 6 : index
    %95 = memref.load %arg1[%c0_47, %c6] : memref<2x7xf32, #tpu.memory_space<smem>>
    %96 = vector.broadcast %95 : f32 to vector<1x128xf32>
    %97 = arith.mulf %96, %93 : vector<1x128xf32>
    %c1_48 = arith.constant 1 : index
    %c6_49 = arith.constant 6 : index
    %98 = memref.load %arg1[%c1_48, %c6_49] : memref<2x7xf32, #tpu.memory_space<smem>>
    %99 = vector.broadcast %98 : f32 to vector<1x128xf32>
    %100 = arith.mulf %99, %94 : vector<1x128xf32>
    %101 = arith.addf %97, %100 : vector<1x128xf32>
    %c125_i32_50 = arith.constant 125 : i32
    %102 = vector.broadcast %c125_i32_50 : i32 to vector<1x128xi32>
    %103 = arith.cmpi slt, %22, %102 : vector<1x128xi32>
    %cst_51 = arith.constant 0.000000e+00 : f32
    %104 = vector.broadcast %cst_51 : f32 to vector<1x128xf32>
    %105 = arith.select %103, %101, %104 : vector<1x128xi1>, vector<1x128xf32>
    %106 = arith.addf %92, %105 : vector<1x128xf32>
    %107 = arith.negf %106 : vector<1x128xf32>
    %108 = math.exp %107 : vector<1x128xf32>
    %cst_52 = arith.constant 1.000000e+00 : f32
    %109 = vector.broadcast %cst_52 : f32 to vector<1x128xf32>
    %110 = arith.addf %109, %108 : vector<1x128xf32>
    %111 = arith.divf %109, %110 : vector<1x128xf32>
    %c0_53 = arith.constant 0 : index
    %c0_54 = arith.constant 0 : index
    %c0_55 = arith.constant 0 : index
    %112 = vector.load %arg3[%c0_53, %c0_54, %c0_55] : memref<1x1x128xf32, #tpu.memory_space<vmem>>, vector<1x1x128xf32>
    %113 = vector.shape_cast %112 : vector<1x1x128xf32> to vector<1x128xf32>
    %114 = vector.shape_cast %111 : vector<1x128xf32> to vector<1x1x128xf32>
    tpu.vector_store %arg3[%c0_53, %c0_54, %c0_55], %114 {strides = array<i32>} : memref<1x1x128xf32, #tpu.memory_space<vmem>>, vector<1x1x128xf32>,
    return
  }
  func.func @transform_0(%arg0: i32) -> (i32, i32) {
    %c0_i32 = arith.constant 0 : i32
    %c0_i32_0 = arith.constant 0 : i32
    %c0_i32_1 = arith.constant 0 : i32
    return %c0_i32, %c0_i32_0 : i32, i32
  }
  func.func @transform_1(%arg0: i32) -> (i32, i32, i32) {
    %c0_i32 = arith.constant 0 : i32
    %c0_i32_0 = arith.constant 0 : i32
    %c0_i32_1 = arith.constant 0 : i32
    return %arg0, %c0_i32, %c0_i32_0 : i32, i32, i32
  }
  func.func @transform_2(%arg0: i32) -> (i32, i32, i32) {
    %c0_i32 = arith.constant 0 : i32
    %c0_i32_0 = arith.constant 0 : i32
    %c0_i32_1 = arith.constant 0 : i32
    return %arg0, %c0_i32, %c0_i32_0 : i32, i32, i32
  }
}

</mosaic_0001>

<bundles_post_ra>
// kernel: tpu_custom_call.1
= control target key start
LH: loop header
LB: loop body
LE: loop exit
PB: predicated region body
PF: predicated region fallthrough
CT: control target
= control target key end

     0   :  { %7 = vsyncpa [#allocation4], 0  ;;  %s706_s0 = inlined_call_operand.vmem [shape: f32[2,7], index: 0, kind: input, shape index: {}]   ;;  %s707_s1 = inlined_call_operand.vmem [shape: f32[2,20,128], index: 1, kind: input, shape index: {}]   ;;  %s708_s2 = inlined_call_operand.hbm [shape: f32[2,1,128], index: 2, kind: output, shape index: {}]  }
   0x1   :  { %8 = vsyncpa [#allocation3], 0 }
   0x2   :  { %10 = vsyncpa [#allocation3 + $0x1], 0  ;;  %s573_s9 = smov 0   ;;  %s575_s10 = smov 0  }
   0x3   :  { %s577_s11 = smov 0   ;;  %s579_s12 = smov 0  }
   0x4 LB: > { %s594_s13 = sadd.s32 4294967295, %s548_s12   ;;  %s382_s14 = sadd.s32 4294967294, %s548_s12   ;;  %s548_s12 = sphi %s579_s12, %s715_s12   ;;  %s544_s11 = sphi %s577_s11, %s714_s11   ;;  %s540_s10 = sphi %s575_s10, %s713_s10   ;;  %s536_s9 = sphi %s573_s9, %s712_s9  }
   0x5   : > { %s598_s15 = sadd.s32 1, %s548_s12   ;;  %s70_s16 = sadd.s32 1, %s544_s11 }
   0x6   : > { %s67_s17 = ssub.s32 %s548_s12, %s598_s15  ;;  %p80_p0 = scmp.ne.s32.totalorder %s544_s11, %s540_s10 }
   0x7   : > { %p68_p1 = scmp.eq.s32.totalorder %s67_s17, 0  ;;  %p81_p2 = scmp.eq.s32.totalorder %s594_s13, 1 }
   0x8   : > { %p86_p3 = scmp.ne.s32.totalorder %s540_s10, %s536_s9  ;;  %p87_p4 = scmp.eq.s32.totalorder %s382_s14, 1 }
   0x9   : > { %s609_s18 = scalar_select %p68_p1, %s544_s11, %s70_s16  }
   0xa   : > { %p611_p5 = por %p81_p2, %p80_p0  ;;  %p615_p6 = por %p87_p4, %p86_p3 }
   0xb   : > { %p383_p7 = scmp.ge.s32.totalorder %s548_s12, 1  ;;  %p94_p8 = scmp.lt.s32.totalorder %s548_s12, 3 }
   0xc   : > { %p421_p9 = scmp.eq.s32.totalorder %s594_s13, 0  ;;  %s107_s24 = sshll.u32 %s706_s0, 4  ;;  %s108_s24 = int_to_ptr.vmem [resolvable:$true] %s107_s24 }
   0xd   : > { %p622_p10 = pnand %p383_p7, %p94_p8  ;;  %s467_s25 = scalar_lea.vmem %s108_s24, 32 }
   0xe   : > { %p468_p13 = scmp.ne.s32.totalorder %s108_s24, %s467_s25  ;;  %p475_p3 = scmp.lt.s32.totalorder %s108_s24, %s108_s24 }
   0xf   : > { %p413_p11 = pneg %p622_p10  ;;  %p476_p4 = scmp.lt.s32.totalorder %s467_s25, %s467_s25 }
  0x11   : > { %p414_p12 = pnand %p421_p9, %p413_p11  ;;  %p477_p7 = por %p476_p4, %p475_p3 }
  0x13   : > { %p469_p0 = pneg %p414_p12 }
  0x15   : > { %p470_p1 = pnand %p469_p0, %p468_p13 }
  0x17   : > { %p471_p2 = pneg %p470_p1 }
  0x19   : > { %p478_p8 = pnand %p477_p7, %p471_p2 }
  0x1b   : > { %481 = shalt.err (!%p478_p8)
}
  0x1c   : > { %s550_s26 = smov [#allocation2]   ;;  %128 = sbr.rel (%p622_p10) target bundleno = 244 (0xf4), region = 28 }
  0x1d   : > { %416 = dma.vmem_to_smem (!%p414_p12), %s108_s24, 32, %s550_s26, [#allocation4]  }
  0x23   : > { %527 = dma.done.wait (%p421_p9), [#allocation4], 32  }
  0x24   : > { %529 = vsyncadd (%p421_p9), [#allocation4], 4294967264 }
  0x25   : > { %134 = sfence }
  0x26   : > { %p150_p11 = scmp.lt.s32.totalorder %s594_s13, 1  ;;  %vm184_vm0 = vcmask 1043456   ;;  %s644_s4 = sld [smem:[#allocation2 + $0x83]]  ;;  %v209_v51 = vlaneseq }
  0x27   : > { %s389_s5 = sld [smem:[#allocation2 + $0x3]]  ;;  %s551_s6 = smov 2  }
  0x28   : > { %s151_s27 = scalar_select %p150_p11, %s594_s13, 1  ;;  %v210_v57 = vand.u32 127, %v209_v51 }
  0x29   : > { %s552_s7 = smov 3   ;;  %s553_s8 = smov 1  }
  0x2a   : > { %s406_s28 = smul.u32 24, %s151_s27  ;;  %s554_s14 = smov 127   ;;  %vm222_vm1 = vcmp.ge.s32.totalorder %v210_v57, 3  ;;  %vm236_vm2 = vcmp.ge.s32.totalorder %v210_v57, 2  ;;  %vm250_vm3 = vcmp.ge.s32.totalorder %v210_v57, 1  ;;  %vm264_vm4 = vcmp.lt.s32.totalorder %v210_v57, 127 }
  0x2b   : > { %s555_s16 = smov 126   ;;  %s556_s17 = smov 125   ;;  %vm278_vm5 = vcmp.lt.s32.totalorder %v210_v57, 126  ;;  %vm292_vm6 = vcmp.lt.s32.totalorder %v210_v57, 125 }
  0x2c   : > { %s154_s3 = scalar_lea.vmem %s707_s1, %s406_s28  ;;  %v206_v41 = vstv %s644_s4  ;;  %s215_s21 = sld [smem:[#allocation2]] }
  0x2d   : > { %v155_v0 = vld [vmem:[%s154_s3] sm:$0xff]  ;;  %v168_v1 = vld [vmem:[%s154_s3 + $0x8] sm:$0xff]  ;;  %v183_v2 = vld [vmem:[%s154_s3 + $0x10] sm:$0xf]  ;;  %v203_v44 = vstv %s389_s5  ;;  %s391_s22 = sld [smem:[#allocation2 + $0x80]]  ;;  %s394_s23 = sld [smem:[#allocation2 + $0x2]] }
  0x2e   : > { %v156_v3 = vrot.slane %v155_v0, 4  ;;  %v169_v4 = vrot.slane %v168_v1, 4  ;;  %v193_v5 = vsel %vm184_vm0, %v183_v2, -inf  ;;  %v185_v6 = vsel %vm184_vm0, %v183_v2, 0.0  ;;  %s393_s24 = sld [smem:[#allocation2 + $0x81]]  ;;  %s395_s25 = sld [smem:[#allocation2 + $0x82]] }
  0x2f   : > { %v194_v7 = vrot.slane %v193_v5, 4  ;;  %v186_v8 = vrot.slane %v185_v6, 4  ;;  %s392_s26 = sld [smem:[#allocation2 + $0x1]]  ;;  %s396_s27 = sld [smem:[#allocation2 + $0x4]] }
  0x30   : > { %v163_v9 = vmax.f32 %v155_v0, %v156_v3  ;;  %v177_v10 = vmax.f32 %v168_v1, %v169_v4  ;;  %v157_v11 = vadd.f32 %v156_v3, %v155_v0  ;;  %v170_v12 = vadd.f32 %v169_v4, %v168_v1  ;;  %s397_s28 = sld [smem:[#allocation2 + $0x84]]  ;;  %s647_s29 = sld [smem:[#allocation2 + $0x85]] }
  0x31   : > { %v195_v13 = vmax.f32 %v193_v5, %v194_v7  ;;  %v187_v14 = vadd.f32 %v186_v8, %v185_v6  ;;  %s649_s30 = sld [smem:[#allocation2 + $0x5]]  ;;  %s651_s3 = sld [smem:[#allocation2 + $0x86]] }
  0x32   : > { %v164_v15 = vrot.slane %v163_v9, 2  ;;  %v178_v16 = vrot.slane %v177_v10, 2  ;;  %v158_v17 = vrot.slane %v157_v11, 2  ;;  %v171_v18 = vrot.slane %v170_v12, 2  ;;  %s653_s4 = sld [smem:[#allocation2 + $0x6]]  ;;  %s148_s5 = sand.u32 1, %s540_s10  }
  0x33   : > { %v196_v19 = vrot.slane %v195_v13, 2  ;;  %v188_v20 = vrot.slane %v187_v14, 2  ;;  %v216_v52 = vstv %s215_s21  ;;  %v219_v53 = vstv %s391_s22  ;;  %s303_s21 = scalar_lea.sflag [#allocation3], %s148_s5 }
  0x34   : > { %v165_v21 = vmax.f32 %v163_v9, %v164_v15  ;;  %v179_v22 = vmax.f32 %v177_v10, %v178_v16  ;;  %v159_v23 = vadd.f32 %v158_v17, %v157_v11  ;;  %v172_v24 = vadd.f32 %v171_v18, %v170_v12 }
  0x35   : > { %v197_v25 = vmax.f32 %v195_v13, %v196_v19  ;;  %v189_v26 = vadd.f32 %v188_v20, %v187_v14  ;;  %v244_v60 = vstv %s394_s23  ;;  %v233_v62 = vstv %s393_s24 }
  0x36   : > { %v166_v27 = vrot.slane %v165_v21, 1  ;;  %v180_v28 = vrot.slane %v179_v22, 1  ;;  %v160_v29 = vrot.slane %v159_v23, 1  ;;  %v173_v30 = vrot.slane %v172_v24, 1 }
  0x37   : > { %v198_v31 = vrot.slane %v197_v25, 1  ;;  %v190_v32 = vrot.slane %v189_v26, 1  ;;  %v247_v0 = vstv %s395_s25  ;;  %v230_v1 = vstv %s392_s26 }
  0x38   : > { %v167_v33 = vmax.f32 %v165_v21, %v166_v27  ;;  %v181_v34 = vmax.f32 %v179_v22, %v180_v28  ;;  %v161_v35 = vadd.f32 %v160_v29, %v159_v23  ;;  %v174_v36 = vadd.f32 %v173_v30, %v172_v24 }
  0x39   : > { %v199_v37 = vmax.f32 %v197_v25, %v198_v31  ;;  %v191_v38 = vadd.f32 %v190_v32, %v189_v26  ;;  %v258_v2 = vstv %s396_s27  ;;  %v261_v5 = vstv %s397_s28 }
  0x3a   : > { %v182_v39 = vmax.f32 %v167_v33, %v181_v34  ;;  %v175_v40 = vadd.f32 %v174_v36, %v161_v35  ;;  %v275_v12 = vstv %s647_s29  ;;  %v272_v13 = vstv %s649_s30 }
  0x3b   : > { %v289_v25 = vstv %s651_s3  ;;  %v286_v26 = vstv %s653_s4 }
  0x3c   : > { %v200_v42 = vmax.f32 %v182_v39, %v199_v37  ;;  %v192_v43 = vadd.f32 %v191_v38, %v175_v40 }
  0x3e   : > { %227 = vrot.lane.b32.xlu1 %v200_v42, %s551_s6  ;;  %213 = vrot.lane.b32.xlu0 %v200_v42, %s552_s7  ;;  %v201_v45 = vmul.f32 0.05, %v192_v43  ;;  %v207_v46 = vmul.f32 %v206_v41, %v200_v42 }
  0x40   : > { %v204_v47 = vmul.f32 %v203_v44, %v201_v45 }
  0x42   : > { %241 = vrot.lane.b32.xlu1 %v200_v42, %s553_s8  ;;  %211 = vrot.lane.b32.xlu0 %v201_v45, %s552_s7  ;;  %v208_v48 = vadd.f32 %v207_v46, %v204_v47  ;;  %s149_s7 = scalar_lea.vmem [#allocation5], %s148_s5 }
  0x46   : > { %255 = vrot.lane.b32.xlu1 %v200_v42, %s554_s14  ;;  %239 = vrot.lane.b32.xlu0 %v201_v45, %s553_s8  ;;  %s315_s8 = sshll.u32 %s149_s7, 4  ;;  %s666_s8 = int_to_ptr.vmem [resolvable:$true] %s315_s8 }
  0x47   : > { %s482_s22 = scalar_lea.vmem %s666_s8, 16 }
  0x48   : > { %p483_p9 = scmp.ne.s32.totalorder %s666_s8, %s482_s22 }
  0x4a   : > { %225 = vrot.lane.b32.xlu1 %v201_v45, %s551_s6  ;;  %253 = vrot.lane.b32.xlu0 %v201_v45, %s554_s14  ;;  %s403_s6 = sshll.u32 %s594_s13, 4  ;;  %p484_p10 = pnand %p483_p9, %p611_p5 }
  0x4b   : > { %s557_s13 = smov [#allocation5]  }
  0x4c   : > { %p485_p12 = pneg %p484_p10  ;;  %s486_s23 = sshll.u32 %s557_s13, 4  ;;  %s487_s23 = int_to_ptr.vmem [resolvable:$false] %s486_s23 }
  0x4d   : > { %s488_s24 = scalar_lea.vmem %s487_s23, 32  ;;  %p489_p13 = scmp.lt.s32.totalorder %s666_s8, %s487_s23 }
  0x4e   : > { %269 = vrot.lane.b32.xlu1 %v200_v42, %s555_s16  ;;  %267 = vrot.lane.b32.xlu0 %v201_v45, %s555_s16  ;;  %p490_p0 = scmp.lt.s32.totalorder %s488_s24, %s482_s22 }
  0x50   : > { %p491_p1 = por %p490_p0, %p489_p13 }
  0x52   : > { %283 = vrot.lane.b32.xlu1 %v200_v42, %s556_s17  ;;  %281 = vrot.lane.b32.xlu0 %v201_v45, %s556_s17  ;;  %s664_s17 = scalar_lea.hbm %s708_s2, %s403_s6  ;;  %p492_p2 = pnand %p491_p1, %p485_p12 }
  0xb0   : > { %v228_v49 = vpop.permute.xlu1 %227  ;;  %v214_v50 = vpop.permute.xlu0 %213 }
  0xb1   : > { %v220_v58 = vmul.f32 %v219_v53, %v214_v50  ;;  %v234_v4 = vmul.f32 %v233_v62, %v228_v49 }
  0xb4   : > { %v242_v54 = vpop.permute.xlu1 %241  ;;  %v212_v55 = vpop.permute.xlu0 %211 }
  0xb5   : > { %v217_v56 = vmul.f32 %v216_v52, %v212_v55  ;;  %v248_v8 = vmul.f32 %v247_v0, %v242_v54 }
  0xb7   : > { %v221_v63 = vadd.f32 %v220_v58, %v217_v56 }
  0xb8   : > { %v256_v59 = vpop.permute.xlu1 %255  ;;  %v240_v61 = vpop.permute.xlu0 %239 }
  0xb9   : > { %v245_v3 = vmul.f32 %v244_v60, %v240_v61  ;;  %v223_v9 = vsel %vm222_vm1, %v221_v63, 0.0  ;;  %v262_v14 = vmul.f32 %v261_v5, %v256_v59 }
  0xba   : > { %v224_v17 = vadd.f32 %v223_v9, %v208_v48 }
  0xbb   : > { %v249_v15 = vadd.f32 %v248_v8, %v245_v3 }
  0xbc   : > { %v226_v6 = vpop.permute.xlu1 %225  ;;  %v254_v7 = vpop.permute.xlu0 %253 }
  0xbd   : > { %v231_v10 = vmul.f32 %v230_v1, %v226_v6  ;;  %v259_v11 = vmul.f32 %v258_v2, %v254_v7  ;;  %v251_v27 = vsel %vm250_vm3, %v249_v15, 0.0 }
  0xbf   : > { %v235_v16 = vadd.f32 %v234_v4, %v231_v10  ;;  %v263_v21 = vadd.f32 %v262_v14, %v259_v11 }
  0xc0   : > { %v270_v18 = vpop.permute.xlu1 %269  ;;  %v268_v19 = vpop.permute.xlu0 %267 }
  0xc1   : > { %v237_v20 = vsel %vm236_vm2, %v235_v16, 0.0  ;;  %v276_v22 = vmul.f32 %v275_v12, %v270_v18  ;;  %v273_v23 = vmul.f32 %v272_v13, %v268_v19  ;;  %v265_v32 = vsel %vm264_vm4, %v263_v21, 0.0 }
  0xc2   : > { %v238_v24 = vadd.f32 %v237_v20, %v224_v17 }
  0xc3   : > { %v277_v28 = vadd.f32 %v276_v22, %v273_v23 }
  0xc4   : > { %v252_v29 = vadd.f32 %v251_v27, %v238_v24  ;;  %v284_v30 = vpop.permute.xlu1 %283  ;;  %v282_v31 = vpop.permute.xlu0 %281 }
  0xc5   : > { %v290_v33 = vmul.f32 %v289_v25, %v284_v30  ;;  %v287_v34 = vmul.f32 %v286_v26, %v282_v31  ;;  %v279_v36 = vsel %vm278_vm5, %v277_v28, 0.0 }
  0xc6   : > { %v266_v35 = vadd.f32 %v265_v32, %v252_v29 }
  0xc7   : > { %v291_v37 = vadd.f32 %v290_v33, %v287_v34 }
  0xc8   : > { %v280_v38 = vadd.f32 %v279_v36, %v266_v35 }
  0xc9   : > { %v293_v39 = vsel %vm292_vm6, %v291_v37, 0.0 }
  0xca   : > { %v294_v40 = vadd.f32 %v293_v39, %v280_v38 }
  0xcc   : > { %v402_v41 = vmul.f32 -1.442695, %v294_v40 }
  0xce   : > { %463 = vpow2.f32 %v402_v41 }
  0xd8   : > { %v464_v42 = vpop.eup %463 }
  0xd9   : > { %v298_v43 = vadd.f32 1.0, %v464_v42 }
  0xdb   : > { %465 = vrcp.f32 %v298_v43 }
  0xe5   : > { %v466_v44 = vpop.eup %465 }
  0xe6   : > { %301 = vst [vmem:[%s149_s7] sm:$0x1] %v466_v44 }
  0xe7   : > { %495 = shalt.err (!%p492_p2)
}
  0xe8   : > { %s496_s25 = scalar_lea.hbm %s664_s17, 16  ;;  %s500_s28 = scalar_lea.hbm %s708_s2, 32 }
  0xe9   : > { %p497_p3 = scmp.ne.s32.totalorder %s664_s17, %s496_s25  ;;  %p501_p8 = scmp.lt.u32.totalorder %s664_s17, %s708_s2 }
  0xea   : > { %p502_p11 = scmp.lt.u32.totalorder %s500_s28, %s496_s25  ;;  %p504_p10 = scmp.lt.u32.totalorder %s496_s25, %s664_s17 }
  0xeb   : > { %p498_p4 = pnand %p497_p3, %p611_p5 }
  0xec   : > { %p503_p9 = por %p502_p11, %p501_p8 }
  0xed   : > { %p499_p7 = pneg %p498_p4 }
  0xee   : > { %p505_p12 = por %p504_p10, %p503_p9 }
  0xf0   : > { %p506_p13 = pnand %p505_p12, %p499_p7 }
  0xf2   : > { %509 = shalt.err (!%p506_p13)
}
  0xf3   : > { %411 = dma.vmem_to_hbm [thread:$0]  (%p611_p5), %s666_s8, 16, %s664_s17, %s303_s21  }
  0xf4 PF: > { %p423_p0 = scmp.ge.s32.totalorder %s548_s12, 2  ;;  %s327_s3 = sand.u32 1, %s536_s9  }
  0xf5   : > { %s328_s4 = scalar_lea.sflag [#allocation3], %s327_s3 }
  0xf6   : > { %p418_p1 = pnand %p423_p0, %p615_p6 }
  0xf8   : > { %531 = dma.done.wait (!%p418_p1), %s328_s4, 16  }
  0xf9   : > { %533 = vsyncadd (!%p418_p1), %s328_s4, 4294967280  ;;  %p13_p2 = scmp.ge.s32.totalorder %s598_s15, 4   ;;  %s712_s9 = smov %s540_s10 }
  0xfa   : > { %s713_s10 = smov %s544_s11  ;;  %s714_s11 = smov %s609_s18 }
  0xfb   : > { %s715_s12 = smov %s598_s15  ;;  %15 = sbr.rel (!%p13_p2) target bundleno = 4 (0x4), region = 68 }
 0x102   :  { %332 = vsyncpa [#allocation3], 1 }
 0x103   :  { %334 = vsyncpa [#allocation3 + $0x1], 1 }
 0x104   :  { %335 = vsyncpa [#allocation4], 1 }
 0x105   :  { %337 = vsyncpa [#allocation4 + $0x1], 1 }

</bundles_post_ra>
